<compile_context>
chip_gen: v7x
topology: tpu7x:2x2x1
jax: 0.10.0
libtpu: 0.0.40
codegen_flags: <defaults>
</compile_context>

<pallas_src>
import jax
import jax.numpy as jnp
from jax.experimental import pallas as pl
from jax.experimental.pallas import tpu as pltpu


def _difference_loss_kernel(y_true_ref, y_pred_ref, mask_ref, out_ref):
    n = y_true_ref.shape[-1]
    inv_n = 1.0 / n

    yt = y_true_ref[...].astype(jnp.float32)   # (TB, N)
    yp = y_pred_ref[...].astype(jnp.float32)   # (TB, N)
    m = mask_ref[...].astype(jnp.float32)      # (TB, N)

    d = yp - yt                                # (TB, N)
    m2 = m * m                                 # squared because the mask hits
                                               # both diffs before the square
    s0 = jnp.sum(m2, axis=-1, keepdims=True)               # (TB, 1)
    s1 = jnp.sum(m2 * d, axis=-1, keepdims=True)           # (TB, 1)
    # Weighted mean of d; guard the all-masked-out row (output is 0 anyway
    # because m_i^2 == 0 there, we just avoid producing NaNs).
    mu = s1 / jnp.where(s0 > 0.0, s0, 1.0)                  # (TB, 1)

    dc = d - mu                                              # (TB, N)
    dc2 = dc * dc
    v = jnp.sum(m2 * dc2, axis=-1, keepdims=True)            # (TB, 1)

    out = (m2 * (s0 * dc2 + v)) * inv_n                      # (TB, N)
    out_ref[...] = out.astype(out_ref.dtype)


def _difference_loss_kernel_nomask(y_true_ref, y_pred_ref, out_ref):
    # Specialized mask=None path: mask == 1 everywhere, so S0 = N, m2 = 1.
    n = y_true_ref.shape[-1]
    inv_n = 1.0 / n

    yt = y_true_ref[...].astype(jnp.float32)   # (TB, N)
    yp = y_pred_ref[...].astype(jnp.float32)   # (TB, N)

    d = yp - yt
    mu = jnp.sum(d, axis=-1, keepdims=True) * inv_n           # (TB, 1)
    dc = d - mu
    dc2 = dc * dc
    v = jnp.sum(dc2, axis=-1, keepdims=True)                  # (TB, 1)

    # out[b, i] = (1/N) * (N * (d_i - mu)^2 + V) = (d_i - mu)^2 + V / N
    out = dc2 + v * inv_n
    out_ref[...] = out.astype(out_ref.dtype)


def _pick_batch_tile(B, block_b):
    """Largest batch tile that is a multiple of 8, divides B, and <= block_b."""
    block_b = max(8, (block_b // 8) * 8)
    if B <= block_b or B % 8 != 0:
        return B
    tb = block_b
    while B % tb != 0:
        tb -= 8
    return tb


def difference_loss(y_true, y_pred, mask=None, *, block_b=128):
    """JAX/Pallas equivalent of DifferenceLoss(MSELoss(reduction='none')).forward."""
    B, N = y_true.shape
    assert y_pred.shape == (B, N), (y_pred.shape, (B, N))
    out_dtype = jnp.promote_types(y_true.dtype, y_pred.dtype)

    tb = _pick_batch_tile(B, block_b)
    grid = (B // tb,)
    tile_spec = pl.BlockSpec((tb, N), lambda i: (i, 0))

    if mask is None:
        kernel = _difference_loss_kernel_nomask
        operands = (y_true, y_pred)
        in_specs = [tile_spec, tile_spec]
    else:
        assert mask.shape == (B, N), (mask.shape, (B, N))
        kernel = _difference_loss_kernel
        operands = (y_true, y_pred, mask)
        in_specs = [tile_spec, tile_spec, tile_spec]

    return pl.pallas_call(
        kernel,
        out_shape=jax.ShapeDtypeStruct((B, N), out_dtype),
        grid_spec=pltpu.PrefetchScalarGridSpec(
            num_scalar_prefetch=0,
            grid=grid,
            in_specs=in_specs,
            out_specs=tile_spec,
        ),
        compiler_params=pltpu.CompilerParams(
            dimension_semantics=("parallel",),
        ),
    )(*operands)


def _reference(y_true, y_pred, mask):
    # Direct O(N^2) pairwise reference, mirroring the torch module op-for-op.
    yt = y_true.astype(jnp.float32)
    yp = y_pred.astype(jnp.float32)
    m = mask.astype(jnp.float32)
    mask2 = m[:, :, None] * m[:, None, :]
    true_d = (yt[:, :, None] - yt[:, None, :]) * mask2
    pred_d = (yp[:, :, None] - yp[:, None, :]) * mask2
    return jnp.mean((pred_d - true_d) ** 2, axis=2)


if __name__ == "__main__":
    key = jax.random.PRNGKey(0)
    k1, k2, k3 = jax.random.split(key, 3)

    # (batch, N): N predictions per sample are compared pairwise against each
    # other. Lane-friendly N=128, two batch tiles of 8 rows each.
    B, N = 16, 128
    y_true = jax.random.normal(k1, (B, N), dtype=jnp.float32)
    y_pred = jax.random.normal(k2, (B, N), dtype=jnp.float32)
    mask = (jax.random.uniform(k3, (B, N)) > 0.25).astype(jnp.float32)

    # Masked path.
    out = jax.block_until_ready(difference_loss(y_true, y_pred, mask, block_b=8))
    ref = _reference(y_true, y_pred, mask)
    assert out.shape == (B, N)
    assert jnp.allclose(out, ref, rtol=1e-4, atol=1e-5), (
        float(jnp.max(jnp.abs(out - ref))))

    # mask=None path (specialized 2-input kernel; no ones-mask HBM stream).
    out_nm = jax.block_until_ready(difference_loss(y_true, y_pred, None))
    ref_nm = _reference(y_true, y_pred, jnp.ones_like(y_true))
    assert jnp.allclose(out_nm, ref_nm, rtol=1e-4, atol=1e-5), (
        float(jnp.max(jnp.abs(out_nm - ref_nm))))

    # bf16 inputs stream at half the HBM bytes; math still accumulates in f32.
    out_bf16 = jax.block_until_ready(
        difference_loss(y_true.astype(jnp.bfloat16),
                        y_pred.astype(jnp.bfloat16),
                        mask.astype(jnp.bfloat16)))
    ref_bf16 = _reference(y_true.astype(jnp.bfloat16),
                          y_pred.astype(jnp.bfloat16),
                          mask.astype(jnp.bfloat16))
    assert jnp.allclose(out_bf16.astype(jnp.float32), ref_bf16,
                        rtol=2e-2, atol=2e-2)

    # Non-8-multiple batch falls back to a single full-extent block.
    out_small = jax.block_until_ready(
        difference_loss(y_true[:5], y_pred[:5], mask[:5]))
    assert jnp.allclose(out_small, _reference(y_true[:5], y_pred[:5], mask[:5]),
                        rtol=1e-4, atol=1e-5)

    print("KERNEL_OK")
</pallas_src>

<mosaic_0001>
module attributes {stable_mosaic.version = 11 : i64} {
  func.func @_difference_loss_kernel(%arg0: i32, %arg1: memref<8x128xf32, #tpu.memory_space<vmem>>, %arg2: memref<8x128xf32, #tpu.memory_space<vmem>>, %arg3: memref<8x128xf32, #tpu.memory_space<vmem>>, %arg4: memref<8x128xf32, #tpu.memory_space<vmem>>) attributes {dimension_semantics = [#tpu.dimension_semantics<parallel>], iteration_bounds = array<i64: 2>, scalar_prefetch = 0 : i64, scratch_operands = 0 : i64, tpu.core_type = #tpu.core_type<tc>, window_params = [{transform_indices = @transform_0, window_bounds = array<i64: 8, 128>}, {transform_indices = @transform_1, window_bounds = array<i64: 8, 128>}, {transform_indices = @transform_2, window_bounds = array<i64: 8, 128>}, {transform_indices = @transform_3, window_bounds = array<i64: 8, 128>}]} {
    %c0 = arith.constant 0 : index
    %c0_0 = arith.constant 0 : index
    %0 = vector.load %arg1[%c0, %c0_0] : memref<8x128xf32, #tpu.memory_space<vmem>>, vector<8x128xf32>
    %c0_1 = arith.constant 0 : index
    %c0_2 = arith.constant 0 : index
    %1 = vector.load %arg2[%c0_1, %c0_2] : memref<8x128xf32, #tpu.memory_space<vmem>>, vector<8x128xf32>
    %c0_3 = arith.constant 0 : index
    %c0_4 = arith.constant 0 : index
    %2 = vector.load %arg3[%c0_3, %c0_4] : memref<8x128xf32, #tpu.memory_space<vmem>>, vector<8x128xf32>
    %3 = arith.subf %1, %0 : vector<8x128xf32>
    %4 = arith.mulf %2, %2 : vector<8x128xf32>
    %cst = arith.constant dense<0.000000e+00> : vector<8xf32>
    %5 = vector.multi_reduction <add>, %4, %cst [1] : vector<8x128xf32> to vector<8xf32>
    %6 = vector.shape_cast %5 : vector<8xf32> to vector<8x1xf32>
    %7 = arith.mulf %4, %3 : vector<8x128xf32>
    %cst_5 = arith.constant dense<0.000000e+00> : vector<8xf32>
    %8 = vector.multi_reduction <add>, %7, %cst_5 [1] : vector<8x128xf32> to vector<8xf32>
    %9 = vector.shape_cast %8 : vector<8xf32> to vector<8x1xf32>
    %cst_6 = arith.constant 0.000000e+00 : f32
    %10 = vector.broadcast %cst_6 : f32 to vector<8x1xf32>
    %11 = arith.cmpf ogt, %6, %10 : vector<8x1xf32>
    %cst_7 = arith.constant 1.000000e+00 : f32
    %12 = vector.broadcast %cst_7 : f32 to vector<8x1xf32>
    %13 = arith.select %11, %6, %12 : vector<8x1xi1>, vector<8x1xf32>
    %14 = arith.divf %9, %13 : vector<8x1xf32>
    %15 = vector.broadcast %14 : vector<8x1xf32> to vector<8x128xf32>
    %16 = arith.subf %3, %15 : vector<8x128xf32>
    %17 = arith.mulf %16, %16 : vector<8x128xf32>
    %18 = arith.mulf %4, %17 : vector<8x128xf32>
    %cst_8 = arith.constant dense<0.000000e+00> : vector<8xf32>
    %19 = vector.multi_reduction <add>, %18, %cst_8 [1] : vector<8x128xf32> to vector<8xf32>
    %20 = vector.shape_cast %19 : vector<8xf32> to vector<8x1xf32>
    %21 = vector.broadcast %6 : vector<8x1xf32> to vector<8x128xf32>
    %22 = arith.mulf %21, %17 : vector<8x128xf32>
    %23 = vector.broadcast %20 : vector<8x1xf32> to vector<8x128xf32>
    %24 = arith.addf %22, %23 : vector<8x128xf32>
    %25 = arith.mulf %4, %24 : vector<8x128xf32>
    %cst_9 = arith.constant 7.812500e-03 : f32
    %26 = vector.broadcast %cst_9 : f32 to vector<8x128xf32>
    %27 = arith.mulf %25, %26 : vector<8x128xf32>
    %c0_10 = arith.constant 0 : index
    %c0_11 = arith.constant 0 : index
    %28 = vector.load %arg4[%c0_10, %c0_11] : memref<8x128xf32, #tpu.memory_space<vmem>>, vector<8x128xf32>
    tpu.vector_store %arg4[%c0_10, %c0_11], %27 {strides = array<i32>} : memref<8x128xf32, #tpu.memory_space<vmem>>, vector<8x128xf32>,
    return
  }
  func.func @transform_0(%arg0: i32) -> (i32, i32) {
    %c0_i32 = arith.constant 0 : i32
    %c0_i32_0 = arith.constant 0 : i32
    return %arg0, %c0_i32 : i32, i32
  }
  func.func @transform_1(%arg0: i32) -> (i32, i32) {
    %c0_i32 = arith.constant 0 : i32
    %c0_i32_0 = arith.constant 0 : i32
    return %arg0, %c0_i32 : i32, i32
  }
  func.func @transform_2(%arg0: i32) -> (i32, i32) {
    %c0_i32 = arith.constant 0 : i32
    %c0_i32_0 = arith.constant 0 : i32
    return %arg0, %c0_i32 : i32, i32
  }
  func.func @transform_3(%arg0: i32) -> (i32, i32) {
    %c0_i32 = arith.constant 0 : i32
    %c0_i32_0 = arith.constant 0 : i32
    return %arg0, %c0_i32 : i32, i32
  }
}

</mosaic_0001>

<bundles_post_ra>
// kernel: tpu_custom_call.1
= control target key start
LH: loop header
LB: loop body
LE: loop exit
PB: predicated region body
PF: predicated region fallthrough
CT: control target
= control target key end

     0   :  { %s905_s0 = inlined_call_operand.hbm [shape: f32[16,128], index: 0, kind: input, shape index: {}]   ;;  %s906_s1 = inlined_call_operand.hbm [shape: f32[16,128], index: 1, kind: input, shape index: {}]   ;;  %s907_s2 = inlined_call_operand.hbm [shape: f32[16,128], index: 2, kind: input, shape index: {}]   ;;  %s908_s3 = inlined_call_operand.hbm [shape: f32[16,128], index: 3, kind: output, shape index: {}]  }
   0x1   :  { %913 = sst [smem:[#allocation12_spill]] %s906_s1 }
   0x2   :  { %8 = vsyncpa [#allocation3], 0 }
   0x3   :  { %10 = vsyncpa [#allocation3 + $0x1], 0 }
   0x4   :  { %11 = vsyncpa [#allocation6], 0 }
   0x5   :  { %13 = vsyncpa [#allocation6 + $0x1], 0 }
   0x6   :  { %14 = vsyncpa [#allocation4], 0 }
   0x7   :  { %16 = vsyncpa [#allocation4 + $0x1], 0  ;;  %s670_s12 = smov 0   ;;  %s672_s13 = smov 0  }
   0x8   :  { %s674_s14 = smov 0   ;;  %s676_s15 = smov 0  }
   0x9 LB: > { %s691_s16 = sadd.s32 4294967295, %s644_s15   ;;  %s408_s17 = sadd.s32 4294967294, %s644_s15   ;;  %s644_s15 = sphi %s676_s15, %s932_s15   ;;  %s640_s14 = sphi %s674_s14, %s931_s14   ;;  %s636_s13 = sphi %s672_s13, %s930_s13   ;;  %s632_s12 = sphi %s670_s12, %s929_s12  }
   0xa   : > { %s695_s18 = sadd.s32 1, %s644_s15   ;;  %s29_s19 = sadd.s32 1, %s640_s14 }
   0xb   : > { %s26_s20 = ssub.s32 %s644_s15, %s695_s18  ;;  %p36_p0 = scmp.ne.s32.totalorder %s640_s14, %s636_s13 }
   0xc   : > { %p27_p1 = scmp.eq.s32.totalorder %s26_s20, 0  ;;  %p37_p2 = scmp.eq.s32.totalorder %s644_s15, 0 }
   0xd   : > { %p42_p3 = scmp.ne.s32.totalorder %s636_s13, %s632_s12  ;;  %p43_p4 = scmp.eq.s32.totalorder %s691_s16, 0 }
   0xe   : > { %s707_s21 = scalar_select %p27_p1, %s640_s14, %s29_s19  }
   0xf   : > { %p38_p5 = por %p37_p2, %p36_p0  ;;  %p709_p6 = por %p43_p4, %p42_p3 }
  0x10   : > { %p118_p7 = scmp.eq.s32.totalorder %s691_s16, 1  ;;  %p124_p8 = scmp.eq.s32.totalorder %s408_s17, 1 }
  0x11   : > { %s914_s22 = scalar_select %p709_p6, 1, 0 }
  0x12   : > { %p448_p10 = scmp.lt.s32.totalorder %s644_s15, 2  ;;  %p716_p11 = por %p118_p7, %p36_p0 }
  0x13   : > { %p720_p12 = por %p124_p8, %p42_p3  ;;  %s144_s25 = sand.u32 1, %s640_s14  }
  0x14   : > { %s915_s23 = scalar_select %p716_p11, 1, 0 }
  0x15   : > { %s916_s24 = scalar_select %p720_p12, 1, 0 }
  0x16   : > { %s726_s26 = sshll.u32 %s644_s15, 7  ;;  %s730_s27 = sshll.u32 %s144_s25, 3 }
  0x17   : > { %p732_p13 = pnand %p448_p10, %p38_p5  ;;  %s162_s29 = sand.u32 1, %s644_s15  }
  0x18   : > { %s918_s1 = sld [smem:[#allocation12_spill]]  ;;  %s166_s6 = scalar_lea.vmem [#allocation5], %s730_s27 }
  0x19   : > { %s917_s28 = scalar_select %p732_p13, 1, 0 }
  0x1a   : > { %s173_s7 = sshll.u32 %s166_s6, 4  ;;  %s747_s8 = scalar_lea.sflag [#allocation6], %s162_s29  ;;  %s744_s7 = int_to_ptr.vmem [resolvable:$true] %s173_s7 }
  0x1b   : > { %p753_p2 = pneg %p732_p13 }
  0x1e   : > { %s741_s5 = scalar_lea.hbm %s918_s1, %s726_s26  ;;  %s489_s19 = scalar_lea.hbm %s918_s1, 256 }
  0x1f   : > { %s484_s9 = scalar_lea.hbm %s741_s5, 128  ;;  %p490_p5 = scmp.lt.u32.totalorder %s741_s5, %s918_s1 }
  0x20   : > { %p485_p1 = scmp.ne.s32.totalorder %s741_s5, %s484_s9  ;;  %p491_p7 = scmp.lt.u32.totalorder %s489_s19, %s484_s9 }
  0x21   : > { %p493_p10 = scmp.lt.u32.totalorder %s484_s9, %s741_s5 }
  0x22   : > { %p487_p3 = pnand %p753_p2, %p485_p1  ;;  %p492_p8 = por %p491_p7, %p490_p5 }
  0x24   : > { %p488_p4 = pneg %p487_p3  ;;  %p494_p9 = por %p493_p10, %p492_p8 }
  0x26   : > { %p495_p0 = pnand %p494_p9, %p488_p4 }
  0x28   : > { %498 = shalt.err (!%p495_p0)
}
  0x29   : > { %s499_s29 = scalar_lea.vmem %s744_s7, 128  ;;  %s646_s4 = smov [#allocation5]  }
  0x2a   : > { %p500_p1 = scmp.ne.s32.totalorder %s744_s7, %s499_s29  ;;  %s504_s6 = sshll.u32 %s646_s4, 4  ;;  %s505_s6 = int_to_ptr.vmem [resolvable:$false] %s504_s6 }
  0x2b   : > { %s506_s11 = scalar_lea.vmem %s505_s6, 256  ;;  %p507_p11 = scmp.lt.s32.totalorder %s744_s7, %s505_s6 }
  0x2c   : > { %p502_p3 = pnand %p500_p1, %p753_p2  ;;  %p508_p6 = scmp.lt.s32.totalorder %s506_s11, %s499_s29 }
  0x2e   : > { %p503_p12 = pneg %p502_p3  ;;  %p509_p5 = por %p508_p6, %p507_p11 }
  0x30   : > { %p510_p7 = pnand %p509_p5, %p503_p12 }
  0x32   : > { %513 = shalt.err (!%p510_p7)
}
  0x33   : > { %440 = dma.hbm_to_vmem [thread:$0]  (!%p732_p13), %s741_s5, 128, %s744_s7, %s747_s8  }
  0x34   : > { %p196_p9 = scmp.lt.s32.totalorder %s644_s15, 3  ;;  %s782_s19 = scalar_lea.hbm %s905_s0, %s726_s26 }
  0x35   : > { %p920_p6 = scmp.ge.s32.totalorder %s644_s15, 1  ;;  %s148_s30 = scalar_lea.vmem [#allocation2], %s730_s27 }
  0x36   : > { %s155_s29 = sshll.u32 %s148_s30, 4  ;;  %s145_s5 = scalar_lea.sflag [#allocation3], %s144_s25  ;;  %s156_s29 = int_to_ptr.vmem [resolvable:$true] %s155_s29 }
  0x37   : > { %p786_p11 = pnand %p920_p6, %p196_p9  ;;  %s514_s7 = scalar_lea.hbm %s782_s19, 128 }
  0x38   : > { %p515_p12 = scmp.ne.s32.totalorder %s782_s19, %s514_s7  ;;  %s519_s11 = scalar_lea.hbm %s905_s0, 256 }
  0x39   : > { %s921_s20 = scalar_select %p786_p11, 1, 0 }
  0x3a   : > { %p517_p0 = pnand %p515_p12, %p753_p2  ;;  %p520_p8 = scmp.lt.u32.totalorder %s782_s19, %s905_s0 }
  0x3b   : > { %p521_p10 = scmp.lt.u32.totalorder %s519_s11, %s514_s7  ;;  %p523_p3 = scmp.lt.u32.totalorder %s514_s7, %s782_s19 }
  0x3c   : > { %p518_p4 = pneg %p517_p0 }
  0x3d   : > { %p522_p1 = por %p521_p10, %p520_p8 }
  0x3f   : > { %p524_p5 = por %p523_p3, %p522_p1 }
  0x41   : > { %p525_p7 = pnand %p524_p5, %p518_p4 }
  0x43   : > { %528 = shalt.err (!%p525_p7)
}
  0x44   : > { %s529_s25 = scalar_lea.vmem %s156_s29, 128  ;;  %s647_s30 = smov [#allocation2]  }
  0x45   : > { %p530_p9 = scmp.ne.s32.totalorder %s156_s29, %s529_s25  ;;  %s534_s1 = sshll.u32 %s647_s30, 4  ;;  %s535_s1 = int_to_ptr.vmem [resolvable:$false] %s534_s1 }
  0x46   : > { %s536_s4 = scalar_lea.vmem %s535_s1, 256  ;;  %p537_p0 = scmp.lt.s32.totalorder %s156_s29, %s535_s1 }
  0x47   : > { %p532_p6 = pnand %p530_p9, %p753_p2  ;;  %p538_p11 = scmp.lt.s32.totalorder %s536_s4, %s529_s25 }
  0x49   : > { %p533_p12 = pneg %p532_p6  ;;  %p539_p13 = por %p538_p11, %p537_p0 }
  0x4b   : > { %p540_p8 = pnand %p539_p13, %p533_p12 }
  0x4d   : > { %543 = shalt.err (!%p540_p8)
}
  0x4e   : > { %p922_p10 = scmp.ne.s32.totalorder %s917_s28, 0  ;;  %s814_s11 = scalar_lea.hbm %s907_s2, %s726_s26 }
  0x4f   : > { %s184_s1 = scalar_lea.vmem [#allocation7], %s730_s27  ;;  %s544_s17 = scalar_lea.hbm %s814_s11, 128 }
  0x50   : > { %437 = dma.hbm_to_vmem [thread:$0]  (!%p922_p10), %s782_s19, 128, %s156_s29, %s145_s5  }
  0x51   : > { %s191_s9 = sshll.u32 %s184_s1, 4  ;;  %p545_p13 = scmp.ne.s32.totalorder %s814_s11, %s544_s17  ;;  %s192_s9 = int_to_ptr.vmem [resolvable:$true] %s191_s9 }
  0x52   : > { %s549_s19 = scalar_lea.hbm %s907_s2, 256  ;;  %p550_p1 = scmp.lt.u32.totalorder %s814_s11, %s907_s2 }
  0x53   : > { %p547_p11 = pnand %p545_p13, %p753_p2  ;;  %p551_p3 = scmp.lt.u32.totalorder %s549_s19, %s544_s17 }
  0x54   : > { %p553_p7 = scmp.lt.u32.totalorder %s544_s17, %s814_s11 }
  0x55   : > { %p548_p4 = pneg %p547_p11  ;;  %p552_p5 = por %p551_p3, %p550_p1 }
  0x57   : > { %p554_p9 = por %p553_p7, %p552_p5 }
  0x59   : > { %p555_p6 = pnand %p554_p9, %p548_p4 }
  0x5b   : > { %558 = shalt.err (!%p555_p6)
}
  0x5c   : > { %s559_s26 = scalar_lea.vmem %s192_s9, 128  ;;  %s648_s27 = smov [#allocation7]  }
  0x5d   : > { %p560_p12 = scmp.ne.s32.totalorder %s192_s9, %s559_s26  ;;  %s564_s4 = sshll.u32 %s648_s27, 4  ;;  %s565_s4 = int_to_ptr.vmem [resolvable:$false] %s564_s4 }
  0x5e   : > { %s566_s7 = scalar_lea.vmem %s565_s4, 256  ;;  %p567_p13 = scmp.lt.s32.totalorder %s192_s9, %s565_s4 }
  0x5f   : > { %p562_p0 = pnand %p560_p12, %p753_p2  ;;  %p568_p11 = scmp.lt.s32.totalorder %s566_s7, %s559_s26 }
  0x61   : > { %p563_p8 = pneg %p562_p0  ;;  %p569_p10 = por %p568_p11, %p567_p13 }
  0x63   : > { %p570_p1 = pnand %p569_p10, %p563_p8 }
  0x65   : > { %573 = shalt.err (!%p570_p1)
}
  0x66   : > { %p923_p3 = scmp.ne.s32.totalorder %s917_s28, 0  ;;  %p924_p4 = scmp.ne.s32.totalorder %s921_s20, 0 }
  0x67   : > { %s838_s10 = sand.u32 (!%p924_p4), 1, %s636_s13   ;;  %p925_p2 = scmp.ne.s32.totalorder (!%p924_p4), %s914_s22, 0 }
  0x68   : > { %443 = dma.hbm_to_vmem [thread:$0]  (!%p923_p3), %s814_s11, 128, %s192_s9, %s747_s8  }
  0x69   : > { %200 = sbr.rel (%p924_p4) target bundleno = 445 (0x1bd), region = 32  ;;  %s841_s6 = sshll.u32 (!%p924_p4), %s838_s10, 3 }
  0x6a   : > { %s203_s1 = scalar_lea.sflag (!%p924_p4), [#allocation3], %s838_s10  ;;  %s206_s17 = scalar_lea.vmem (!%p924_p4), [#allocation2], %s841_s6 }
  0x70   : > { %619 = dma.done.wait (%p925_p2), %s203_s1, 128  }
  0x71   : > { %621 = vsyncadd (%p925_p2), %s203_s1, 4294967168  ;;  %s211_s28 = sand.u32 1, %s691_s16   ;;  %s215_s20 = scalar_lea.vmem [#allocation5], %s841_s6 }
  0x72   : > { %s212_s8 = scalar_lea.sflag [#allocation6], %s211_s28 }
  0x73   : > { %623 = dma.done.wait (%p925_p2), %s212_s8, 256  }
  0x74   : > { %625 = vsyncadd (%p925_p2), %s212_s8, 4294967040  ;;  %s224_s11 = scalar_lea.vmem [#allocation7], %s841_s6  ;;  %v257_v1 = vld [vmem:[%s206_s17] sm:$0xff]  ;;  %v258_v2 = vld [vmem:[%s215_s20] sm:$0xff]  ;;  %s423_s22 = sshll.u32 %s691_s16, 7 }
  0x75   : > { %v259_v0 = vld [vmem:[%s224_s11] sm:$0xff]  ;;  %v260_v4 = vsub.f32 %v258_v2, %v257_v1  ;;  %s256_s9 = scalar_lea.vmem [#allocation8], %s841_s6  ;;  %s861_s29 = scalar_lea.hbm %s908_s3, %s423_s22 }
  0x76   : > { %v261_v3 = vmul.f32 %v259_v0, %v259_v0  ;;  %s295_s25 = sshll.u32 %s256_s9, 4  ;;  %s282_s5 = scalar_lea.sflag [#allocation4], %s838_s10  ;;  %s863_s25 = int_to_ptr.vmem [resolvable:$true] %s295_s25 }
  0x77   : > { %s574_s26 = scalar_lea.vmem %s863_s25, 128  ;;  %p926_p5 = scmp.ne.s32.totalorder %s915_s23, 0 }
  0x78   : > { %262 = vadd.xlane.f32.xlu0 %v261_v3  ;;  %v264_v5 = vmul.f32 %v261_v3, %v260_v4  ;;  %p575_p10 = scmp.ne.s32.totalorder %s863_s25, %s574_s26  ;;  %s649_s16 = smov [#allocation8]  }
  0x79   : > { %s578_s27 = sshll.u32 %s649_s16, 4  ;;  %s579_s27 = int_to_ptr.vmem [resolvable:$false] %s578_s27 }
  0x7a   : > { %p576_p7 = pnand %p575_p10, %p926_p5  ;;  %s580_s4 = scalar_lea.vmem %s579_s27, 256 }
  0x7b   : > { %p581_p6 = scmp.lt.s32.totalorder %s863_s25, %s579_s27  ;;  %p582_p12 = scmp.lt.s32.totalorder %s580_s4, %s574_s26 }
  0x7c   : > { %265 = vadd.xlane.f32.xlu0 %v264_v5  ;;  %p577_p9 = pneg %p576_p7 }
  0x7d   : > { %p583_p0 = por %p582_p12, %p581_p6 }
  0x7f   : > { %p584_p8 = pnand %p583_p0, %p577_p9 }
 0x105   : > { %v263_v6 = vpop.xlane.xlu0 %262 }
 0x106   : > { %vm267_vm0 = vcmp.gt.f32.partialorder %v263_v6, 0.0 }
 0x107   : > { %v268_v7 = vsel %vm267_vm0, %v263_v6, 1.0 }
 0x108   : > { %482 = vrcp.f32 %v268_v7 }
 0x109   : > { %v266_v8 = vpop.xlane.xlu0 %265 }
 0x112   : > { %v483_v9 = vpop.eup %482 }
 0x113   : > { %v270_v10 = vmul.f32 %v483_v9, %v266_v8 }
 0x115   : > { %v271_v11 = vsub.f32 %v260_v4, %v270_v10 }
 0x117   : > { %v272_v12 = vmul.f32 %v271_v11, %v271_v11 }
 0x119   : > { %v273_v13 = vmul.f32 %v272_v12, %v261_v3  ;;  %v276_v14 = vmul.f32 %v272_v12, %v263_v6 }
 0x11b   : > { %274 = vadd.xlane.f32.xlu1 %v273_v13 }
 0x1a8   : > { %v275_v15 = vpop.xlane.xlu1 %274 }
 0x1a9   : > { %v277_v16 = vadd.f32 %v276_v14, %v275_v15 }
 0x1ab   : > { %v278_v17 = vmul.f32 %v277_v16, %v261_v3 }
 0x1ad   : > { %v279_v18 = vmul.f32 0.0078125, %v278_v17 }
 0x1af   : > { %280 = vst [vmem:[%s256_s9] sm:$0xff] %v279_v18 }
 0x1b0   : > { %587 = shalt.err (!%p584_p8)
}
 0x1b1   : > { %s588_s7 = scalar_lea.hbm %s861_s29, 128  ;;  %s592_s1 = scalar_lea.hbm %s908_s3, 256 }
 0x1b2   : > { %p589_p13 = scmp.ne.s32.totalorder %s861_s29, %s588_s7  ;;  %p593_p3 = scmp.lt.u32.totalorder %s861_s29, %s908_s3 }
 0x1b3   : > { %p594_p4 = scmp.lt.u32.totalorder %s592_s1, %s588_s7  ;;  %p596_p10 = scmp.lt.u32.totalorder %s588_s7, %s861_s29 }
 0x1b4   : > { %p590_p11 = pnand %p589_p13, %p926_p5 }
 0x1b5   : > { %p595_p2 = por %p594_p4, %p593_p3 }
 0x1b6   : > { %p591_p1 = pneg %p590_p11 }
 0x1b7   : > { %p597_p7 = por %p596_p10, %p595_p2 }
 0x1b9   : > { %p598_p9 = pnand %p597_p7, %p591_p1 }
 0x1bb   : > { %601 = shalt.err (!%p598_p9)
}
 0x1bc   : > { %432 = dma.vmem_to_hbm [thread:$0]  (%p926_p5), %s863_s25, 128, %s861_s29, %s282_s5  }
 0x1bd PF: > { %s307_s8 = sand.u32 1, %s632_s12   ;;  %p927_p6 = scmp.ne.s32.totalorder %s916_s24, 0 }
 0x1be   : > { %p928_p12 = scmp.ge.s32.totalorder %s644_s15, 2  ;;  %s308_s20 = scalar_lea.sflag [#allocation4], %s307_s8 }
 0x1c0   : > { %p445_p0 = pnand %p928_p12, %p927_p6 }
 0x1c2   : > { %627 = dma.done.wait (!%p445_p0), %s308_s20, 128  }
 0x1c3   : > { %629 = vsyncadd (!%p445_p0), %s308_s20, 4294967168  ;;  %p19_p8 = scmp.ge.s32.totalorder %s695_s18, 4   ;;  %s929_s12 = smov %s636_s13 }
 0x1c4   : > { %s930_s13 = smov %s640_s14  ;;  %s931_s14 = smov %s707_s21 }
 0x1c5   : > { %s932_s15 = smov %s695_s18  ;;  %21 = sbr.rel (!%p19_p8) target bundleno = 9 (0x9), region = 101 }
 0x1cc   :  { %313 = vsyncpa [#allocation3], 1 }
 0x1cd   :  { %315 = vsyncpa [#allocation3 + $0x1], 1 }
 0x1ce   :  { %316 = vsyncpa [#allocation6], 1 }
 0x1cf   :  { %318 = vsyncpa [#allocation6 + $0x1], 1 }
 0x1d0   :  { %319 = vsyncpa [#allocation4], 1 }
 0x1d1   :  { %321 = vsyncpa [#allocation4 + $0x1], 1 }

</bundles_post_ra>
